<compile_context>
chip_gen: v7x
topology: tpu7x:2x2x1
jax: 0.10.0
libtpu: 0.0.40
codegen_flags: <defaults>
</compile_context>

<pallas_src>
import functools

import jax
import jax.numpy as jnp
from jax.experimental import pallas as pl
from jax.experimental.pallas import tpu as pltpu

LANES = 128
SUBLANES = 8
GROUP = SUBLANES * LANES            # one (8,128) vreg worth of f32 elements
MAX_TILE_GROUPS = 128               # 1024 x 128 f32 tile = 512 KiB per input
FAST_PATH_MAX_ELEMS = 2048          # tiny logits: skip all wrapper plumbing
NUM_CORE_SPLITS = 2                 # "parallel" leading axis (2 TCs on v7x)


# ---------------------------------------------------------------------------
# Shared per-element math / finalize (used by both kernels and the wrapper).
# ---------------------------------------------------------------------------
def _n_acc(loss_type):
    return 2 if loss_type == "wasserstein" else 3


def _contributions(real, fake, loss_type):
    """Per-element loss pieces to be summed. Element 0 is real-based, the rest
    are fake-based (the tiled kernel relies on this ordering for masking)."""
    if loss_type == "bce":
        # softplus(x) = max(x, 0) + log1p(exp(-|x|)).  Share the transcendental
        # term between softplus(fake) and softplus(-fake): 2 EUP ops per fake
        # element instead of 4 (the BCE path is EUP-slot bound).
        sp_neg_real = jnp.maximum(-real, 0.0) + jnp.log1p(jnp.exp(-jnp.abs(real)))
        t_fake = jnp.log1p(jnp.exp(-jnp.abs(fake)))
        sp_pos_fake = jnp.maximum(fake, 0.0) + t_fake
        sp_neg_fake = jnp.maximum(-fake, 0.0) + t_fake
        return [sp_neg_real, sp_pos_fake, sp_neg_fake]
    if loss_type == "wasserstein":
        return [real, fake]
    # hinge
    return [jnp.maximum(1.0 - real, 0.0), jnp.maximum(1.0 + fake, 0.0), fake]


def _finalize(sums, n_real, n_fake, loss_type):
    """Turn the raw sums into (d_loss, g_loss). Works on traced scalars."""
    inv_r = 1.0 / float(n_real)
    inv_f = 1.0 / float(n_fake)
    if loss_type == "bce":
        d = 0.5 * (sums[0] * inv_r + sums[1] * inv_f)
        g = sums[2] * inv_f
    elif loss_type == "wasserstein":
        mean_r = sums[0] * inv_r
        mean_f = sums[1] * inv_f
        d = -mean_r + mean_f
        g = -mean_f
    else:  # hinge
        d = sums[0] * inv_r + sums[1] * inv_f
        g = -(sums[2] * inv_f)
    return d, g


# ---------------------------------------------------------------------------
# Kernels.
# ---------------------------------------------------------------------------
def _adv_small_kernel(real_ref, fake_ref, out_ref, *, loss_type, n_real, n_fake):
    """Single-step kernel for small logits: full-array blocks, no masks."""
    real = real_ref[...].astype(jnp.float32)
    fake = fake_ref[...].astype(jnp.float32)
    parts = _contributions(real, fake, loss_type)
    sums = [jnp.sum(p) for p in parts]
    d, g = _finalize(sums, n_real, n_fake, loss_type)
    out_ref[0] = d
    out_ref[1] = g


def _adv_tiled_kernel(real_ref, fake_ref, out_ref, *, loss_type, n_real, n_fake,
                      tile_groups, tiles_per_split):
    """Accumulator-carried reduction over lane-dense (groups, 8, 128) tiles.

    Grid = (core_split [parallel], tile [arbitrary]).  The output block
    (n_acc, 8, 128) stays resident across the inner axis and acts as a VMEM
    vector accumulator: per tile we only do masked element-wise work plus a
    leading-axis fold (pure vreg adds); the XLU reduce happens in the wrapper.
    """
    c = pl.program_id(0)
    t = pl.program_id(1)

    @pl.when(t == 0)
    def _():
        out_ref[...] = jnp.zeros_like(out_ref)

    shape = (tile_groups, SUBLANES, LANES)
    g0 = (c * tiles_per_split + t) * tile_groups
    i0 = jax.lax.broadcasted_iota(jnp.int32, shape, 0)
    i1 = jax.lax.broadcasted_iota(jnp.int32, shape, 1)
    i2 = jax.lax.broadcasted_iota(jnp.int32, shape, 2)
    idx = ((g0 + i0) * SUBLANES + i1) * LANES + i2     # flat element index
    real_valid = idx < n_real                          # tail-padding masks only
    fake_valid = idx < n_fake

    real = real_ref[...].astype(jnp.float32)           # bf16 upcast in-kernel
    fake = fake_ref[...].astype(jnp.float32)
    parts = _contributions(real, fake, loss_type)
    masks = [real_valid] + [fake_valid] * (len(parts) - 1)

    for i, (p, m) in enumerate(zip(parts, masks)):
        # Fold the leading (untiled) axis: tile_groups vregs -> one vreg (VALU).
        out_ref[i] += jnp.sum(jnp.where(m, p, 0.0), axis=0)


# ---------------------------------------------------------------------------
# Wrapper.
# ---------------------------------------------------------------------------
def _as_2d(x):
    if x.ndim == 2:
        return x
    if x.ndim == 0:
        return x.reshape(1, 1)
    return x.reshape(-1, x.shape[-1])


def _to_groups(x):
    """Flatten and lane-densify to (groups, 8, 128), preserving dtype."""
    flat = jnp.ravel(x)
    n = flat.size
    groups = pl.cdiv(n, GROUP)
    pad = groups * GROUP - n
    if pad:
        flat = jnp.pad(flat, (0, pad))
    return flat.reshape(groups, SUBLANES, LANES), groups


def _pad_groups(x, groups):
    if x.shape[0] == groups:
        return x
    return jnp.pad(x, ((0, groups - x.shape[0]), (0, 0), (0, 0)))


def adversarial_loss(real_logits, fake_logits, loss_type: str = "bce"):
    """Returns (discriminator_loss, generator_loss) as f32 scalars."""
    if loss_type not in ("bce", "wasserstein", "hinge"):
        raise ValueError(f"Unknown adversarial loss type: {loss_type}")
    n_real = int(real_logits.size)
    n_fake = int(fake_logits.size)
    if n_real == 0 or n_fake == 0:
        raise ValueError("AdversarialLoss requires non-empty real and fake logits.")

    # ---- Fast path: the real genconvit case, (batch, 1) logits, tiny batch.
    if n_real <= FAST_PATH_MAX_ELEMS and n_fake <= FAST_PATH_MAX_ELEMS:
        real2d = _as_2d(real_logits)
        fake2d = _as_2d(fake_logits)
        kern = functools.partial(_adv_small_kernel, loss_type=loss_type,
                                 n_real=n_real, n_fake=n_fake)
        out = pl.pallas_call(
            kern,
            out_shape=jax.ShapeDtypeStruct((2,), jnp.float32),
            grid_spec=pltpu.PrefetchScalarGridSpec(
                num_scalar_prefetch=0,
                grid=(1,),
                in_specs=[pl.BlockSpec(real2d.shape, lambda i: (0, 0)),
                          pl.BlockSpec(fake2d.shape, lambda i: (0, 0))],
                out_specs=pl.BlockSpec(memory_space=pltpu.MemorySpace.SMEM),
            ),
            compiler_params=pltpu.CompilerParams(
                dimension_semantics=("arbitrary",)),
        )(real2d, fake2d)
        return out[0], out[1]

    # ---- Tiled path: lane-dense tiles, two separate input streams.
    real_g, r_groups = _to_groups(real_logits)
    fake_g, f_groups = _to_groups(fake_logits)
    total_groups = max(r_groups, f_groups)

    if total_groups <= MAX_TILE_GROUPS:
        tile_groups = total_groups
        num_tiles = 1
    else:
        tile_groups = MAX_TILE_GROUPS
        num_tiles = pl.cdiv(total_groups, tile_groups)

    num_splits = NUM_CORE_SPLITS if num_tiles >= 2 else 1
    tiles_per_split = pl.cdiv(num_tiles, num_splits)
    padded_groups = num_splits * tiles_per_split * tile_groups

    real_g = _pad_groups(real_g, padded_groups)
    fake_g = _pad_groups(fake_g, padded_groups)

    n_acc = _n_acc(loss_type)
    kern = functools.partial(_adv_tiled_kernel, loss_type=loss_type,
                             n_real=n_real, n_fake=n_fake,
                             tile_groups=tile_groups,
                             tiles_per_split=tiles_per_split)

    partials = pl.pallas_call(
        kern,
        out_shape=jax.ShapeDtypeStruct((num_splits, n_acc, SUBLANES, LANES),
                                       jnp.float32),
        grid_spec=pltpu.PrefetchScalarGridSpec(
            num_scalar_prefetch=0,
            grid=(num_splits, tiles_per_split),
            in_specs=[
                pl.BlockSpec((tile_groups, SUBLANES, LANES),
                             lambda c, t: (c * tiles_per_split + t, 0, 0)),
                pl.BlockSpec((tile_groups, SUBLANES, LANES),
                             lambda c, t: (c * tiles_per_split + t, 0, 0)),
            ],
            out_specs=pl.BlockSpec((None, n_acc, SUBLANES, LANES),
                                   lambda c, t: (c, 0, 0, 0)),
        ),
        compiler_params=pltpu.CompilerParams(
            dimension_semantics=("parallel", "arbitrary"),
            vmem_limit_bytes=32 << 20,
        ),
    )(real_g, fake_g)

    # Tiny combine: per-core (8,128) partials -> scalars, then divide. This is
    # the one XLU/XLA reduction for the whole input.
    sums = jnp.sum(partials, axis=(0, 2, 3))
    return _finalize(sums, n_real, n_fake, loss_type)


# ---------------------------------------------------------------------------
# Pure-JAX reference for correctness checks.
# ---------------------------------------------------------------------------
def _reference(real_logits, fake_logits, loss_type):
    real = real_logits.astype(jnp.float32)
    fake = fake_logits.astype(jnp.float32)
    sp = lambda x: jnp.maximum(x, 0.0) + jnp.log1p(jnp.exp(-jnp.abs(x)))
    if loss_type == "bce":
        d = 0.5 * (jnp.mean(sp(-real)) + jnp.mean(sp(fake)))
        g = jnp.mean(sp(-fake))
    elif loss_type == "wasserstein":
        d = -jnp.mean(real) + jnp.mean(fake)
        g = -jnp.mean(fake)
    else:  # hinge
        d = jnp.mean(jnp.maximum(1.0 - real, 0.0)) + jnp.mean(jnp.maximum(1.0 + fake, 0.0))
        g = -jnp.mean(fake)
    return d, g


if __name__ == "__main__":
    key = jax.random.PRNGKey(0)
    k1, k2, k3, k4 = jax.random.split(key, 4)

    # Small discriminator logits (batch, 1), matching the PyTorch module.
    batch = 8
    real_small = jax.random.normal(k1, (batch, 1), dtype=jnp.float32)
    fake_small = jax.random.normal(k2, (batch, 1), dtype=jnp.float32)
    for lt in ("bce", "wasserstein", "hinge"):
        d_loss, g_loss = adversarial_loss(real_small, fake_small, loss_type=lt)
        jax.block_until_ready((d_loss, g_loss))
        d_ref, g_ref = _reference(real_small, fake_small, lt)
        assert jnp.allclose(d_loss, d_ref, atol=1e-5, rtol=1e-5), (lt, d_loss, d_ref)
        assert jnp.allclose(g_loss, g_ref, atol=1e-5, rtol=1e-5), (lt, g_loss, g_ref)

    # Also exercise the lane-dense tiled / core-split reduction path.
    big = 600_000
    real_big = jax.random.normal(k3, (big, 1), dtype=jnp.float32)
    fake_big = jax.random.normal(k4, (big, 1), dtype=jnp.float32)
    for lt in ("bce", "wasserstein", "hinge"):
        d_loss, g_loss = adversarial_loss(real_big, fake_big, loss_type=lt)
        jax.block_until_ready((d_loss, g_loss))
        d_ref, g_ref = _reference(real_big, fake_big, lt)
        assert jnp.allclose(d_loss, d_ref, atol=1e-4, rtol=1e-4), (lt, d_loss, d_ref)
        assert jnp.allclose(g_loss, g_ref, atol=1e-4, rtol=1e-4), (lt, g_loss, g_ref)

    print("KERNEL_OK")
</pallas_src>

<mosaic_0001>
module attributes {stable_mosaic.version = 11 : i64} {
  func.func @_adv_small_kernel(%arg0: i32, %arg1: memref<8x1xf32, #tpu.memory_space<vmem>>, %arg2: memref<8x1xf32, #tpu.memory_space<vmem>>, %arg3: memref<2xf32, #tpu.memory_space<smem>>) attributes {dimension_semantics = [#tpu.dimension_semantics<arbitrary>], iteration_bounds = array<i64: 1>, scalar_prefetch = 0 : i64, scratch_operands = 0 : i64, tpu.core_type = #tpu.core_type<tc>, window_params = [{pipeline_mode = #tpu.pipeline_mode<synchronous>, transform_indices = @transform_0, window_bounds = array<i64: 8, 1>}, {pipeline_mode = #tpu.pipeline_mode<synchronous>, transform_indices = @transform_1, window_bounds = array<i64: 8, 1>}, {transform_indices = @transform_2, window_bounds = array<i64: 2>}]} {
    %c0 = arith.constant 0 : index
    %c0_0 = arith.constant 0 : index
    %0 = vector.load %arg1[%c0, %c0_0] : memref<8x1xf32, #tpu.memory_space<vmem>>, vector<8x1xf32>
    %c0_1 = arith.constant 0 : index
    %c0_2 = arith.constant 0 : index
    %1 = vector.load %arg2[%c0_1, %c0_2] : memref<8x1xf32, #tpu.memory_space<vmem>>, vector<8x1xf32>
    %cst = arith.constant 0.000000e+00 : f32
    %2 = vector.broadcast %cst : f32 to vector<8x1xf32>
    %3 = arith.subf %2, %0 : vector<8x1xf32>
    %cst_3 = arith.constant 0.000000e+00 : f32
    %4 = vector.broadcast %cst_3 : f32 to vector<8x1xf32>
    %5 = arith.maximumf %3, %4 : vector<8x1xf32>
    %6 = math.absf %0 : vector<8x1xf32>
    %cst_4 = arith.constant 0.000000e+00 : f32
    %7 = vector.broadcast %cst_4 : f32 to vector<8x1xf32>
    %8 = arith.subf %7, %6 : vector<8x1xf32>
    %9 = math.exp %8 : vector<8x1xf32>
    %10 = math.log1p %9 : vector<8x1xf32>
    %11 = arith.addf %5, %10 : vector<8x1xf32>
    %12 = math.absf %1 : vector<8x1xf32>
    %cst_5 = arith.constant 0.000000e+00 : f32
    %13 = vector.broadcast %cst_5 : f32 to vector<8x1xf32>
    %14 = arith.subf %13, %12 : vector<8x1xf32>
    %15 = math.exp %14 : vector<8x1xf32>
    %16 = math.log1p %15 : vector<8x1xf32>
    %cst_6 = arith.constant 0.000000e+00 : f32
    %17 = vector.broadcast %cst_6 : f32 to vector<8x1xf32>
    %18 = arith.maximumf %1, %17 : vector<8x1xf32>
    %19 = arith.addf %18, %16 : vector<8x1xf32>
    %cst_7 = arith.constant 0.000000e+00 : f32
    %20 = vector.broadcast %cst_7 : f32 to vector<8x1xf32>
    %21 = arith.subf %20, %1 : vector<8x1xf32>
    %cst_8 = arith.constant 0.000000e+00 : f32
    %22 = vector.broadcast %cst_8 : f32 to vector<8x1xf32>
    %23 = arith.maximumf %21, %22 : vector<8x1xf32>
    %24 = arith.addf %23, %16 : vector<8x1xf32>
    %25 = vector.shape_cast %11 : vector<8x1xf32> to vector<1x8x1xf32>
    %cst_9 = arith.constant dense<0.000000e+00> : vector<1xf32>
    %26 = vector.multi_reduction <add>, %25, %cst_9 [1, 2] : vector<1x8x1xf32> to vector<1xf32>
    %27 = vector.shape_cast %26 : vector<1xf32> to vector<1x1x1xf32>
    %28 = vector.extract %27[0, 0, 0] : f32 from vector<1x1x1xf32>
    %29 = vector.shape_cast %19 : vector<8x1xf32> to vector<1x8x1xf32>
    %cst_10 = arith.constant dense<0.000000e+00> : vector<1xf32>
    %30 = vector.multi_reduction <add>, %29, %cst_10 [1, 2] : vector<1x8x1xf32> to vector<1xf32>
    %31 = vector.shape_cast %30 : vector<1xf32> to vector<1x1x1xf32>
    %32 = vector.extract %31[0, 0, 0] : f32 from vector<1x1x1xf32>
    %33 = vector.shape_cast %24 : vector<8x1xf32> to vector<1x8x1xf32>
    %cst_11 = arith.constant dense<0.000000e+00> : vector<1xf32>
    %34 = vector.multi_reduction <add>, %33, %cst_11 [1, 2] : vector<1x8x1xf32> to vector<1xf32>
    %35 = vector.shape_cast %34 : vector<1xf32> to vector<1x1x1xf32>
    %36 = vector.extract %35[0, 0, 0] : f32 from vector<1x1x1xf32>
    %cst_12 = arith.constant 1.250000e-01 : f32
    %37 = arith.mulf %28, %cst_12 : f32
    %cst_13 = arith.constant 1.250000e-01 : f32
    %38 = arith.mulf %32, %cst_13 : f32
    %39 = arith.addf %37, %38 : f32
    %cst_14 = arith.constant 5.000000e-01 : f32
    %40 = arith.mulf %cst_14, %39 : f32
    %cst_15 = arith.constant 1.250000e-01 : f32
    %41 = arith.mulf %36, %cst_15 : f32
    %c0_16 = arith.constant 0 : index
    %42 = memref.load %arg3[%c0_16] : memref<2xf32, #tpu.memory_space<smem>>
    memref.store %40, %arg3[%c0_16] : memref<2xf32, #tpu.memory_space<smem>>
    %c1 = arith.constant 1 : index
    %43 = memref.load %arg3[%c1] : memref<2xf32, #tpu.memory_space<smem>>
    memref.store %41, %arg3[%c1] : memref<2xf32, #tpu.memory_space<smem>>
    return
  }
  func.func @transform_0(%arg0: i32) -> (i32, i32) {
    %c0_i32 = arith.constant 0 : i32
    %c0_i32_0 = arith.constant 0 : i32
    %c0_i32_1 = arith.constant 0 : i32
    return %c0_i32, %c0_i32_0 : i32, i32
  }
  func.func @transform_1(%arg0: i32) -> (i32, i32) {
    %c0_i32 = arith.constant 0 : i32
    %c0_i32_0 = arith.constant 0 : i32
    %c0_i32_1 = arith.constant 0 : i32
    return %c0_i32, %c0_i32_0 : i32, i32
  }
  func.func @transform_2(%arg0: i32) -> i32 {
    %c0_i32 = arith.constant 0 : i32
    %c0_i32_0 = arith.constant 0 : i32
    return %c0_i32 : i32
  }
}

</mosaic_0001>

<bundles_post_ra>
// kernel: tpu_custom_call.1
= control target key start
LH: loop header
LB: loop body
LE: loop exit
PB: predicated region body
PF: predicated region fallthrough
CT: control target
= control target key end

     0   :  { %s162_s0 = inlined_call_operand.vmem [shape: f32[8,1], index: 0, kind: input, shape index: {}]   ;;  %s163_s1 = inlined_call_operand.vmem [shape: f32[8,1], index: 1, kind: input, shape index: {}]   ;;  %s164_s2 = inlined_call_operand.hbm [shape: f32[2], index: 2, kind: output, shape index: {}]  }
   0x1   :  { %v12_v0 = vld [vmem:[%s162_s0] sm:$0xff] }
   0x2   :  { %v13_v1 = vld [vmem:[%s163_s1] sm:$0xff] }
   0x3   :  { %7 = vsyncpa [#allocation3], 0  ;;  %v16_v2 = vand.u32 2147483647, %v12_v0  ;;  %v30_v3 = vand.u32 2147483647, %v13_v1 }
   0x4   :  { %v14_v15 = vsub.f32 0.0, %v12_v0  ;;  %v45_v19 = vsub.f32 0.0, %v13_v1  ;;  %v43_v27 = vmax.f32 %v13_v1, 0.0  ;;  %vm48_vm2 = vcmask 7168   ;;  %s116_s21 = scalar_lea.hbm %s164_s2, 16 }
   0x5   :  { %v17_v4 = vsub.f32 0.0, %v16_v2  ;;  %v31_v5 = vsub.f32 0.0, %v30_v3  ;;  %p117_p0 = scmp.ne.s32.totalorder %s164_s2, %s116_s21  ;;  %p120_p1 = scmp.lt.u32.totalorder %s116_s21, %s164_s2 }
   0x6   :  { %v15_v22 = vmax.f32 %v14_v15, 0.0  ;;  %v46_v26 = vmax.f32 %v45_v19, 0.0 }
   0x7   :  { %v18_v6 = vmul.f32 1.442695, %v17_v4  ;;  %v32_v7 = vmul.f32 1.442695, %v31_v5  ;;  %p122_p2 = pnand %p120_p1, %p117_p0 }
   0x9   :  { %108 = vpow2.f32 %v18_v6 }
   0xa   :  { %110 = vpow2.f32 %v32_v7 }
  0x13   :  { %v109_v8 = vpop.eup %108 }
  0x14   :  { %v111_v9 = vpop.eup %110  ;;  %v20_v10 = vadd.f32 1.0, %v109_v8  ;;  %v23_v12 = vmul.f32 -0.5, %v109_v8  ;;  %v26_v16 = vand.u32 2147483647, %v109_v8 }
  0x15   :  { %v34_v11 = vadd.f32 1.0, %v111_v9  ;;  %v37_v13 = vmul.f32 -0.5, %v111_v9  ;;  %v40_v18 = vand.u32 2147483647, %v111_v9 }
  0x16   :  { %112 = vlog2.f32 %v20_v10  ;;  %v24_v14 = vadd.f32 1.0, %v23_v12  ;;  %vm27_vm0 = vcmp.lt.f32.partialorder %v26_v16, 0.0004427343 }
  0x17   :  { %114 = vlog2.f32 %v34_v11  ;;  %v38_v17 = vadd.f32 1.0, %v37_v13  ;;  %vm41_vm1 = vcmp.lt.f32.partialorder %v40_v18, 0.0004427343 }
  0x18   :  { %v25_v20 = vmul.f32 %v109_v8, %v24_v14 }
  0x19   :  { %v39_v23 = vmul.f32 %v111_v9, %v38_v17 }
  0x20   :  { %v113_v21 = vpop.eup %112 }
  0x21   :  { %v115_v24 = vpop.eup %114  ;;  %v22_v25 = vmul.f32 0.6931472, %v113_v21 }
  0x22   :  { %v36_v28 = vmul.f32 0.6931472, %v115_v24 }
  0x23   :  { %v28_v29 = vsel %vm27_vm0, %v25_v20, %v22_v25 }
  0x24   :  { %v29_v30 = vadd.f32 %v28_v29, %v15_v22  ;;  %v42_v31 = vsel %vm41_vm1, %v39_v23, %v36_v28 }
  0x25   :  { %v47_v32 = vadd.f32 %v46_v26, %v42_v31  ;;  %v44_v33 = vadd.f32 %v43_v27, %v42_v31 }
  0x26   :  { %v49_v34 = vsel %vm48_vm2, %v29_v30, 0.0 }
  0x27   :  { %50 = vadd.xlane.f32.xlu0 %v49_v34  ;;  %v69_v35 = vsel %vm48_vm2, %v47_v32, 0.0  ;;  %v59_v36 = vsel %vm48_vm2, %v44_v33, 0.0 }
  0x28   :  { %70 = vadd.xlane.f32.xlu1 %v69_v35 }
  0x2b   :  { %60 = vadd.xlane.f32.xlu0 %v59_v36 }
  0xb4   :  { %v51_v37 = vpop.xlane.xlu0 %50 }
  0xb5   :  { %v52_v38 = vrot.slane %v51_v37, 4  ;;  %v71_v39 = vpop.xlane.xlu1 %70 }
  0xb6   :  { %v72_v40 = vrot.slane %v71_v39, 4 }
  0xb7   :  { %v53_v41 = vadd.f32 %v52_v38, %v51_v37 }
  0xb8   :  { %v73_v42 = vadd.f32 %v72_v40, %v71_v39  ;;  %v61_v43 = vpop.xlane.xlu0 %60 }
  0xb9   :  { %v54_v44 = vrot.slane %v53_v41, 2  ;;  %v62_v45 = vrot.slane %v61_v43, 4 }
  0xba   :  { %v74_v46 = vrot.slane %v73_v42, 2 }
  0xbb   :  { %v63_v47 = vadd.f32 %v62_v45, %v61_v43  ;;  %v55_v48 = vadd.f32 %v54_v44, %v53_v41 }
  0xbc   :  { %v75_v49 = vadd.f32 %v74_v46, %v73_v42 }
  0xbd   :  { %v64_v50 = vrot.slane %v63_v47, 2  ;;  %v56_v51 = vrot.slane %v55_v48, 1 }
  0xbe   :  { %v76_v54 = vrot.slane %v75_v49, 1 }
  0xbf   :  { %v65_v52 = vadd.f32 %v64_v50, %v63_v47  ;;  %v57_v53 = vadd.f32 %v56_v51, %v55_v48 }
  0xc0   :  { %v77_v57 = vadd.f32 %v76_v54, %v75_v49 }
  0xc1   :  { %101 = vpush %v57_v53  ;;  %v66_v55 = vrot.slane %v65_v52, 1 }
  0xc3   :  { %v67_v56 = vadd.f32 %v66_v55, %v65_v52 }
  0xc5   :  { %103 = vpush %v67_v56 }
  0xc6   :  { %105 = vpush %v77_v57 }
  0xf2   :  { %s102_s0 = spop %101 }
  0xf3   :  { %s79_s1 = smul.f32 0.125, %s102_s0 }
  0xf6   :  { %s104_s13 = spop %103 }
  0xf7   :  { %s80_s14 = smul.f32 0.125, %s104_s13  ;;  %s106_s15 = spop %105 }
  0xf8   :  { %s83_s16 = smul.f32 0.125, %s106_s15 }
  0xf9   :  { %s81_s17 = sadd.f32 %s80_s14, %s79_s1 }
  0xfa   :  { %87 = sst [smem:[#allocation2 + $0x1]] %s83_s16 }
  0xfb   :  { %s82_s18 = smul.f32 0.5, %s81_s17 }
  0xfd   :  { %85 = sst [smem:[#allocation2]] %s82_s18 }
  0xfe   :  { %125 = shalt.err (!%p122_p2)
}
  0xff   :  { %s128_s26 = smov [#allocation2]  }
 0x100   :  { %95 = dma.smem_to_hbm %s128_s26, 16, %s164_s2, [#allocation3]  }
 0x101   :  { %126 = dma.done.wait [#allocation3], 16  }
 0x102   :  { %127 = vsyncadd [#allocation3], 4294967280 }
 0x103   :  { %99 = sfence }
 0x104   :  { %100 = vsyncpa [#allocation3], 1 }

</bundles_post_ra>
